<compile_context>
chip_gen: v7x
topology: tpu7x:2x2x1
jax: 0.10.0
libtpu: 0.0.40
codegen_flags: <defaults>
</compile_context>

<pallas_src>
import functools

import jax
import jax.numpy as jnp
from jax.experimental import pallas as pl
from jax.experimental.pallas import tpu as pltpu


def _ic_kernel(seed_ref, x_ref, gamma_ref, beta_ref, o_ref, *,
               drop_rate, eps, c_tile):
    # x_ref: (N, C_tile, S) ; gamma_ref/beta_ref: (C_tile, 1) ; seed_ref: SMEM (1,)
    n, c, s = x_ref.shape
    x = x_ref[...].astype(jnp.float32)

    # ---- BatchNorm2d batch statistics, single traversal (sum & sum of sq) ----
    inv_count = jnp.float32(1.0 / (n * s))
    s1 = jnp.sum(jnp.sum(x, axis=2, keepdims=True), axis=0, keepdims=True)      # (1, c, 1)
    s2 = jnp.sum(jnp.sum(x * x, axis=2, keepdims=True), axis=0, keepdims=True)  # (1, c, 1)
    mean = s1 * inv_count
    var = s2 * inv_count - mean * mean            # biased variance (torch BN)
    inv_std = jax.lax.rsqrt(var + jnp.float32(eps))

    gamma = gamma_ref[...].astype(jnp.float32)    # (c, 1) -> broadcasts as (1, c, 1)
    beta = beta_ref[...].astype(jnp.float32)

    keep_scale = jnp.float32(1.0 / (1.0 - drop_rate)) if drop_rate > 0.0 else jnp.float32(1.0)
    # Fold BN affine + dropout rescale into one per-channel scale / shift.
    a = gamma * inv_std * keep_scale                          # (1, c, 1)
    b = (beta - gamma * inv_std * mean) * keep_scale          # (1, c, 1)

    y = x * a + b

    # ---- Dropout (inverted): counter-based hash -> Bernoulli(1-p) mask ----
    if drop_rate > 0.0:
        seed_u = seed_ref[0].astype(jnp.uint32)
        c_off = (pl.program_id(0) * c_tile).astype(jnp.uint32)
        i_n = jax.lax.broadcasted_iota(jnp.int32, (n, c, s), 0).astype(jnp.uint32)
        i_c = jax.lax.broadcasted_iota(jnp.int32, (n, c, s), 1).astype(jnp.uint32) + c_off
        i_s = jax.lax.broadcasted_iota(jnp.int32, (n, c, s), 2).astype(jnp.uint32)
        # Polynomial combine of (spatial, channel, batch, seed) ...
        h = i_s
        h = h * jnp.uint32(0x9E3779B1) + i_c
        h = h * jnp.uint32(0x85EBCA77) + i_n
        h = h * jnp.uint32(0xC2B2AE3D) + seed_u
        # ... then murmur3 fmix32 finalizer.
        h = h ^ (h >> 16)
        h = h * jnp.uint32(0x85EBCA6B)
        h = h ^ (h >> 13)
        h = h * jnp.uint32(0xC2B2AE35)
        h = h ^ (h >> 16)
        # 31-bit value, signed-int compare against an integer threshold.
        r = (h >> 1).astype(jnp.int32)
        threshold = jnp.int32(int(drop_rate * (1 << 31)))
        y = jnp.where(r >= threshold, y, jnp.float32(0.0))

    o_ref[...] = y.astype(o_ref.dtype)


def _pick_c_tile(n, c, hw, dtype_bytes, max_tile_bytes):
    """Largest channel tile (multiple of 8, dividing C) whose double-buffered
    in+out blocks stay within max_tile_bytes.  Falls back to full C when C is
    not sublane-aligned (the (8,128) rule allows full-extent dims)."""
    if c % 8 != 0:
        return c
    per_channel_bytes = n * hw * dtype_bytes * 4   # in + out, each double-buffered
    c_tile = (max_tile_bytes // per_channel_bytes) // 8 * 8
    c_tile = max(8, min(c, c_tile))
    while c % c_tile != 0:
        c_tile -= 8
    return c_tile


def ic_layer(x_nchw, gamma, beta, seed, *, drop_rate=0.3, eps=1e-5,
             max_tile_bytes=24 * 1024 * 1024):
    """Forward pass of IC_layer (training mode).  x_nchw: (N, C, H, W)."""
    N, C, H, W = x_nchw.shape
    HW = H * W

    x3d = x_nchw.reshape(N, C, HW)                      # free, contiguous reshape
    gamma2d = gamma.reshape(C, 1).astype(jnp.float32)
    beta2d = beta.reshape(C, 1).astype(jnp.float32)
    seed_arr = jnp.asarray([seed], dtype=jnp.int32)

    dtype_bytes = jnp.dtype(x3d.dtype).itemsize
    c_tile = _pick_c_tile(N, C, HW, dtype_bytes, max_tile_bytes)
    num_c_tiles = C // c_tile

    kernel = functools.partial(
        _ic_kernel, drop_rate=float(drop_rate), eps=float(eps), c_tile=c_tile)

    # NOTE: input_output_aliases={1: 0} would save the output HBM allocation
    # when the caller donates x; omitted here so the standalone test stays
    # copy/warning free.
    out3d = pl.pallas_call(
        kernel,
        out_shape=jax.ShapeDtypeStruct((N, C, HW), x3d.dtype),
        grid=(num_c_tiles,),
        in_specs=[
            pl.BlockSpec(memory_space=pltpu.SMEM),                      # seed scalar
            pl.BlockSpec((N, c_tile, HW), lambda ci: (0, ci, 0)),       # x
            pl.BlockSpec((c_tile, 1), lambda ci: (ci, 0)),              # gamma
            pl.BlockSpec((c_tile, 1), lambda ci: (ci, 0)),              # beta
        ],
        out_specs=pl.BlockSpec((N, c_tile, HW), lambda ci: (0, ci, 0)),
        compiler_params=pltpu.CompilerParams(
            dimension_semantics=("parallel",),       # shard channel tiles across TCs (v7x)
            vmem_limit_bytes=48 * 1024 * 1024,       # within v7x's 64 MiB physical VMEM
        ),
    )(seed_arr, x3d, gamma2d, beta2d)

    return out3d.reshape(N, C, H, W)


def _reference_batchnorm(x, gamma, beta, eps=1e-5):
    mean = jnp.mean(x, axis=(0, 2, 3), keepdims=True)
    var = jnp.mean((x - mean) ** 2, axis=(0, 2, 3), keepdims=True)
    xn = (x - mean) * jax.lax.rsqrt(var + eps)
    return xn * gamma.reshape(1, -1, 1, 1) + beta.reshape(1, -1, 1, 1)


if __name__ == "__main__":
    key = jax.random.PRNGKey(0)
    kx, kg, kb = jax.random.split(key, 3)

    N, C, H, W = 2, 16, 16, 16
    x = jax.random.normal(kx, (N, C, H, W), dtype=jnp.float32)
    # BatchNorm2d default init is gamma=1, beta=0; perturb so affine is exercised.
    gamma = 1.0 + 0.1 * jax.random.normal(kg, (C,), dtype=jnp.float32)
    beta = 0.1 * jax.random.normal(kb, (C,), dtype=jnp.float32)

    # 1) BatchNorm-only path (drop_rate=0): check against a pure-JAX reference.
    out_bn = jax.block_until_ready(ic_layer(x, gamma, beta, seed=0, drop_rate=0.0))
    ref_bn = _reference_batchnorm(x, gamma, beta)
    assert out_bn.shape == (N, C, H, W)
    assert jnp.allclose(out_bn, ref_bn, atol=1e-3, rtol=1e-3), "BatchNorm mismatch"

    # 2) Full IC layer (BN + dropout p=0.3); small tile budget to exercise a
    #    multi-step channel grid (c_tile=8 -> grid=(2,)).
    out = jax.block_until_ready(
        ic_layer(x, gamma, beta, seed=1234, drop_rate=0.3, max_tile_bytes=64 * 1024))
    assert out.shape == (N, C, H, W)
    assert jnp.isfinite(out).all()
    zero_frac = float(jnp.mean(out == 0.0))
    assert abs(zero_frac - 0.3) < 0.1, f"dropout zero-fraction off: {zero_frac}"

    print("KERNEL_OK")
</pallas_src>

<mosaic_0001>
module attributes {stable_mosaic.version = 11 : i64} {
  func.func @_ic_kernel(%arg0: i32, %arg1: memref<1xi32, #tpu.memory_space<smem>>, %arg2: memref<2x16x256xf32, #tpu.memory_space<vmem>>, %arg3: memref<16x1xf32, #tpu.memory_space<vmem>>, %arg4: memref<16x1xf32, #tpu.memory_space<vmem>>, %arg5: memref<2x16x256xf32, #tpu.memory_space<vmem>>) attributes {dimension_semantics = [#tpu.dimension_semantics<parallel>], iteration_bounds = array<i64: 1>, scalar_prefetch = 0 : i64, scratch_operands = 0 : i64, tpu.core_type = #tpu.core_type<tc>, window_params = [{transform_indices = @transform_0, window_bounds = array<i64: 1>}, {transform_indices = @transform_1, window_bounds = array<i64: 2, 16, 256>}, {transform_indices = @transform_2, window_bounds = array<i64: 16, 1>}, {transform_indices = @transform_3, window_bounds = array<i64: 16, 1>}, {transform_indices = @transform_4, window_bounds = array<i64: 2, 16, 256>}]} {
    %c0 = arith.constant 0 : index
    %c0_0 = arith.constant 0 : index
    %c0_1 = arith.constant 0 : index
    %0 = vector.load %arg2[%c0, %c0_0, %c0_1] : memref<2x16x256xf32, #tpu.memory_space<vmem>>, vector<2x16x256xf32>
    %cst = arith.constant dense<0.000000e+00> : vector<2x16xf32>
    %1 = vector.multi_reduction <add>, %0, %cst [2] : vector<2x16x256xf32> to vector<2x16xf32>
    %2 = vector.shape_cast %1 : vector<2x16xf32> to vector<2x16x1xf32>
    %cst_2 = arith.constant dense<0.000000e+00> : vector<16x1xf32>
    %3 = vector.multi_reduction <add>, %2, %cst_2 [0] : vector<2x16x1xf32> to vector<16x1xf32>
    %4 = vector.shape_cast %3 : vector<16x1xf32> to vector<1x16x1xf32>
    %5 = arith.mulf %0, %0 : vector<2x16x256xf32>
    %cst_3 = arith.constant dense<0.000000e+00> : vector<2x16xf32>
    %6 = vector.multi_reduction <add>, %5, %cst_3 [2] : vector<2x16x256xf32> to vector<2x16xf32>
    %7 = vector.shape_cast %6 : vector<2x16xf32> to vector<2x16x1xf32>
    %cst_4 = arith.constant dense<0.000000e+00> : vector<16x1xf32>
    %8 = vector.multi_reduction <add>, %7, %cst_4 [0] : vector<2x16x1xf32> to vector<16x1xf32>
    %9 = vector.shape_cast %8 : vector<16x1xf32> to vector<1x16x1xf32>
    %cst_5 = arith.constant 0.001953125 : f32
    %10 = vector.broadcast %cst_5 : f32 to vector<1x16x1xf32>
    %11 = arith.mulf %4, %10 : vector<1x16x1xf32>
    %cst_6 = arith.constant 0.001953125 : f32
    %12 = vector.broadcast %cst_6 : f32 to vector<1x16x1xf32>
    %13 = arith.mulf %9, %12 : vector<1x16x1xf32>
    %14 = arith.mulf %11, %11 : vector<1x16x1xf32>
    %15 = arith.subf %13, %14 : vector<1x16x1xf32>
    %cst_7 = arith.constant 9.99999974E-6 : f32
    %16 = vector.broadcast %cst_7 : f32 to vector<1x16x1xf32>
    %17 = arith.addf %15, %16 : vector<1x16x1xf32>
    %18 = math.rsqrt %17 : vector<1x16x1xf32>
    %c0_8 = arith.constant 0 : index
    %c0_9 = arith.constant 0 : index
    %19 = vector.load %arg3[%c0_8, %c0_9] : memref<16x1xf32, #tpu.memory_space<vmem>>, vector<16x1xf32>
    %c0_10 = arith.constant 0 : index
    %c0_11 = arith.constant 0 : index
    %20 = vector.load %arg4[%c0_10, %c0_11] : memref<16x1xf32, #tpu.memory_space<vmem>>, vector<16x1xf32>
    %21 = vector.shape_cast %19 : vector<16x1xf32> to vector<1x16x1xf32>
    %22 = arith.mulf %21, %18 : vector<1x16x1xf32>
    %cst_12 = arith.constant 1.000000e+00 : f32
    %23 = vector.broadcast %cst_12 : f32 to vector<1x16x1xf32>
    %24 = arith.mulf %22, %23 : vector<1x16x1xf32>
    %25 = vector.shape_cast %19 : vector<16x1xf32> to vector<1x16x1xf32>
    %26 = arith.mulf %25, %18 : vector<1x16x1xf32>
    %27 = arith.mulf %26, %11 : vector<1x16x1xf32>
    %28 = vector.shape_cast %20 : vector<16x1xf32> to vector<1x16x1xf32>
    %29 = arith.subf %28, %27 : vector<1x16x1xf32>
    %cst_13 = arith.constant 1.000000e+00 : f32
    %30 = vector.broadcast %cst_13 : f32 to vector<1x16x1xf32>
    %31 = arith.mulf %29, %30 : vector<1x16x1xf32>
    %32 = vector.broadcast %24 : vector<1x16x1xf32> to vector<2x16x256xf32>
    %33 = arith.mulf %0, %32 : vector<2x16x256xf32>
    %34 = vector.broadcast %31 : vector<1x16x1xf32> to vector<2x16x256xf32>
    %35 = arith.addf %33, %34 : vector<2x16x256xf32>
    %c0_14 = arith.constant 0 : index
    %c0_15 = arith.constant 0 : index
    %c0_16 = arith.constant 0 : index
    %36 = vector.load %arg5[%c0_14, %c0_15, %c0_16] : memref<2x16x256xf32, #tpu.memory_space<vmem>>, vector<2x16x256xf32>
    tpu.vector_store %arg5[%c0_14, %c0_15, %c0_16], %35 {strides = array<i32>} : memref<2x16x256xf32, #tpu.memory_space<vmem>>, vector<2x16x256xf32>,
    return
  }
  func.func @transform_0(%arg0: i32) -> i32 {
    %c0_i32 = arith.constant 0 : i32
    %c0_i32_0 = arith.constant 0 : i32
    return %c0_i32 : i32
  }
  func.func @transform_1(%arg0: i32) -> (i32, i32, i32) {
    %c0_i32 = arith.constant 0 : i32
    %c0_i32_0 = arith.constant 0 : i32
    %c0_i32_1 = arith.constant 0 : i32
    return %c0_i32, %arg0, %c0_i32_0 : i32, i32, i32
  }
  func.func @transform_2(%arg0: i32) -> (i32, i32) {
    %c0_i32 = arith.constant 0 : i32
    %c0_i32_0 = arith.constant 0 : i32
    return %arg0, %c0_i32 : i32, i32
  }
  func.func @transform_3(%arg0: i32) -> (i32, i32) {
    %c0_i32 = arith.constant 0 : i32
    %c0_i32_0 = arith.constant 0 : i32
    return %arg0, %c0_i32 : i32, i32
  }
  func.func @transform_4(%arg0: i32) -> (i32, i32, i32) {
    %c0_i32 = arith.constant 0 : i32
    %c0_i32_0 = arith.constant 0 : i32
    %c0_i32_1 = arith.constant 0 : i32
    return %c0_i32, %arg0, %c0_i32_0 : i32, i32, i32
  }
}

</mosaic_0001>

<bundles_post_ra>
// kernel: tpu_custom_call.1
= control target key start
LH: loop header
LB: loop body
LE: loop exit
PB: predicated region body
PF: predicated region fallthrough
CT: control target
= control target key end

     0   :  { %10 = vsyncpa [#allocation4], 0  ;;  %s339_s0 = inlined_call_operand.<no memory space> [shape: s32[1], index: 0, kind: input, shape index: {}]   ;;  %s340_s1 = inlined_call_operand.hbm [shape: f32[2,16,256], index: 1, kind: input, shape index: {}]   ;;  %s341_s2 = inlined_call_operand.vmem [shape: f32[16,1], index: 2, kind: input, shape index: {}]   ;;  %s342_s3 = inlined_call_operand.vmem [shape: f32[16,1], index: 3, kind: input, shape index: {}]   ;;  %s343_s4 = inlined_call_operand.hbm [shape: f32[2,16,256], index: 4, kind: output, shape index: {}]  }
   0x1   :  { %11 = vsyncpa [#allocation5], 0  ;;  %s219_s15 = smov [#allocation3]   ;;  %s171_s0 = scalar_lea.hbm %s340_s1, 1024 }
   0x2   :  { %s19_s16 = sshll.u32 %s219_s15, 4  ;;  %p172_p0 = scmp.ne.s32.totalorder %s340_s1, %s171_s0  ;;  %s20_s16 = int_to_ptr.vmem [resolvable:$true] %s19_s16 }
   0x3   :  { %p175_p1 = scmp.lt.u32.totalorder %s171_s0, %s340_s1 }
   0x5   :  { %p177_p2 = pnand %p175_p1, %p172_p0 }
   0x7   :  { %180 = shalt.err (!%p177_p2)
}
   0x8   :  { %s181_s23 = scalar_lea.vmem %s20_s16, 1024  ;;  %p186_p4 = scmp.lt.s32.totalorder %s20_s16, %s20_s16 }
   0x9   :  { %p182_p3 = scmp.ne.s32.totalorder %s20_s16, %s181_s23  ;;  %p187_p5 = scmp.lt.s32.totalorder %s181_s23, %s181_s23 }
   0xb   :  { %p188_p6 = por %p187_p5, %p186_p4 }
   0xd   :  { %p189_p7 = pnand %p188_p6, %p182_p3 }
   0xf   :  { %192 = shalt.err (!%p189_p7)
}
  0x10   :  { %s220_s24 = smov 256   ;;  %s221_s25 = smov 16  }
  0x11   :  { %25 = dma.hbm_to_vmem [thread:$0]  %s340_s1, 1024, %s20_s16, [#allocation4], %s220_s24, %s220_s24, %s221_s25  }
  0x12   :  { %215 = dma.done.wait [#allocation4], 1024  }
  0x13   :  { %216 = vsyncadd [#allocation4], 4294966272  ;;  %v264_v0 = vld [vmem:[#allocation3 + $0x20] sm:$0xff]  ;;  %v266_v1 = vld [vmem:[#allocation3 + $0x28] sm:$0xff]  ;;  %v222_v24 = vmov 0  }
  0x14   :  { %v268_v2 = vld [vmem:[#allocation3] sm:$0xff]  ;;  %v47_v3 = vadd.f32 %v266_v1, %v264_v0  ;;  %v272_v4 = vld [vmem:[#allocation3 + $0x8] sm:$0xff]  ;;  %v274_v5 = vld [vmem:[#allocation3 + $0x30] sm:$0xff]  ;;  %v59_v20 = vmul.f32 %v264_v0, %v264_v0  ;;  %v60_v21 = vmul.f32 %v266_v1, %v266_v1  ;;  %166 = vset.pattern.permute.xlu1 %v222_v24  ;;  %165 = vset.pattern.permute.xlu0 %v222_v24 }
  0x15   :  { %v276_v6 = vld [vmem:[#allocation3 + $0x38] sm:$0xff]  ;;  %v41_v7 = vadd.f32 %v272_v4, %v268_v2  ;;  %v280_v8 = vld [vmem:[#allocation3 + $0x10] sm:$0xff]  ;;  %v55_v14 = vmul.f32 %v268_v2, %v268_v2  ;;  %v56_v15 = vmul.f32 %v272_v4, %v272_v4  ;;  %v61_v17 = vmul.f32 %v274_v5, %v274_v5  ;;  %v90_v47 = vld [vmem:[%s341_s2 + $0x8] sm:$0xff] }
  0x16   :  { %v282_v9 = vld [vmem:[#allocation3 + $0x18] sm:$0xff]  ;;  %48 = vadd.xlane.f32.xlu1 %v47_v3  ;;  %v50_v10 = vadd.f32 %v276_v6, %v274_v5  ;;  %v57_v11 = vmul.f32 %v280_v8, %v280_v8  ;;  %v62_v18 = vmul.f32 %v276_v6, %v276_v6  ;;  %v69_v23 = vadd.f32 %v60_v21, %v59_v20  ;;  %v89_v48 = vld [vmem:[%s341_s2] sm:$0xff]  ;;  %v92_v57 = vld [vmem:[%s342_s3 + $0x8] sm:$0xff]  ;;  %s223_s2 = smov [#allocation6]  }
  0x17   :  { %v58_v12 = vmul.f32 %v282_v9, %v282_v9  ;;  %42 = vadd.xlane.f32.xlu0 %v41_v7  ;;  %v44_v13 = vadd.f32 %v282_v9, %v280_v8  ;;  %v63_v19 = vadd.f32 %v56_v15, %v55_v14  ;;  %v91_v53 = vld [vmem:[%s342_s3] sm:$0xff]  ;;  %s148_s3 = sshll.u32 %s223_s2, 4  ;;  %s149_s3 = int_to_ptr.vmem [resolvable:$true] %s148_s3 }
  0x18   :  { %v72_v22 = vadd.f32 %v62_v18, %v61_v17  ;;  %s193_s9 = scalar_lea.vmem %s149_s3, 1024  ;;  %p198_p9 = scmp.lt.s32.totalorder %s149_s3, %s149_s3 }
  0x19   :  { %v66_v16 = vadd.f32 %v58_v12, %v57_v11  ;;  %p194_p8 = scmp.ne.s32.totalorder %s149_s3, %s193_s9  ;;  %p199_p10 = scmp.lt.s32.totalorder %s193_s9, %s193_s9 }
  0x1a   :  { %51 = vadd.xlane.f32.xlu1 %v50_v10 }
  0x1b   :  { %45 = vadd.xlane.f32.xlu0 %v44_v13  ;;  %p200_p11 = por %p199_p10, %p198_p9 }
  0x1d   :  { %p201_p12 = pnand %p200_p11, %p194_p8 }
  0x1e   :  { %67 = vadd.xlane.f32.xlu1 %v66_v16 }
  0x1f   :  { %64 = vadd.xlane.f32.xlu0 %v63_v19 }
  0x22   :  { %73 = vadd.xlane.f32.xlu1 %v72_v22 }
  0x23   :  { %70 = vadd.xlane.f32.xlu0 %v69_v23 }
  0xa3   :  { %v49_v25 = vpop.xlane.xlu1 %48 }
  0xa4   :  { %v43_v26 = vpop.xlane.xlu0 %42 }
  0xa5   :  { %v53_v30 = vadd.f32 %v49_v25, %v43_v26 }
  0xa7   :  { %v52_v27 = vpop.xlane.xlu1 %51  ;;  %v77_v34 = vmul.f32 0.001953125, %v53_v30 }
  0xa8   :  { %v46_v28 = vpop.xlane.xlu0 %45 }
  0xa9   :  { %v54_v29 = vadd.f32 %v52_v27, %v46_v28  ;;  %v81_v41 = vmul.f32 %v77_v34, %v77_v34 }
  0xab   :  { %v68_v31 = vpop.xlane.xlu1 %67  ;;  %v78_v33 = vmul.f32 0.001953125, %v54_v29 }
  0xac   :  { %v65_v32 = vpop.xlane.xlu0 %64 }
  0xad   :  { %v82_v39 = vmul.f32 %v78_v33, %v78_v33 }
  0xaf   :  { %v74_v35 = vpop.xlane.xlu1 %73 }
  0xb0   :  { %v76_v36 = vadd.f32 %v74_v35, %v68_v31  ;;  %v71_v37 = vpop.xlane.xlu0 %70 }
  0xb1   :  { %v75_v38 = vadd.f32 %v71_v37, %v65_v32 }
  0xb2   :  { %v80_v40 = vmul.f32 0.001953125, %v76_v36 }
  0xb3   :  { %v79_v42 = vmul.f32 0.001953125, %v75_v38 }
  0xb4   :  { %v84_v43 = vsub.f32 %v80_v40, %v82_v39 }
  0xb5   :  { %v83_v44 = vsub.f32 %v79_v42, %v81_v41 }
  0xb6   :  { %v86_v45 = vadd.f32 1e-05, %v84_v43 }
  0xb7   :  { %v85_v46 = vadd.f32 1e-05, %v83_v44 }
  0xb8   :  { %167 = vrsqrt.f32 %v86_v45 }
  0xb9   :  { %169 = vrsqrt.f32 %v85_v46 }
  0xc2   :  { %v168_v49 = vpop.eup %167 }
  0xc3   :  { %v170_v50 = vpop.eup %169  ;;  %v94_v51 = vmul.f32 %v168_v49, %v90_v47 }
  0xc4   :  { %v93_v52 = vmul.f32 %v170_v50, %v89_v48 }
  0xc5   :  { %106 = vperm.xlu1 %166, %v94_v51   ;;  %v96_v56 = vmul.f32 %v94_v51, %v78_v33 }
  0xc6   :  { %101 = vperm.xlu0 %165, %v93_v52   ;;  %v95_v54 = vmul.f32 %v93_v52, %v77_v34 }
  0xc7   :  { %v98_v58 = vsub.f32 %v92_v57, %v96_v56 }
  0xc8   :  { %v97_v55 = vsub.f32 %v91_v53, %v95_v54 }
  0xca   :  { %119 = vperm.xlu1 %166, %v97_v55  }
  0xce   :  { %124 = vperm.xlu1 %166, %v98_v58  }
 0x144   :  { %v107_v59 = vpop.permute.xlu1 %106 }
 0x145   :  { %v102_v60 = vpop.permute.xlu0 %101  ;;  %v111_v14 = vmul.f32 %v107_v59, %v280_v8 }
 0x146   :  { %v109_v61 = vmul.f32 %v102_v60, %v268_v2  ;;  %v110_v62 = vmul.f32 %v102_v60, %v272_v4  ;;  %v113_v63 = vmul.f32 %v102_v60, %v264_v0  ;;  %v114_v3 = vmul.f32 %v102_v60, %v266_v1 }
 0x147   :  { %v112_v2 = vmul.f32 %v107_v59, %v282_v9  ;;  %v115_v4 = vmul.f32 %v107_v59, %v274_v5  ;;  %v116_v0 = vmul.f32 %v107_v59, %v276_v6 }
 0x149   :  { %v120_v7 = vpop.permute.xlu1 %119 }
 0x14a   :  { %v127_v10 = vadd.f32 %v120_v7, %v109_v61  ;;  %v128_v11 = vadd.f32 %v120_v7, %v110_v62  ;;  %v131_v12 = vadd.f32 %v120_v7, %v113_v63  ;;  %v132_v13 = vadd.f32 %v120_v7, %v114_v3 }
 0x14c   :  { %135 = vst [vmem:[#allocation6] sm:$0xff] %v127_v10  ;;  %136 = vst [vmem:[#allocation6 + $0x8] sm:$0xff] %v128_v11 }
 0x14d   :  { %139 = vst [vmem:[#allocation6 + $0x20] sm:$0xff] %v131_v12  ;;  %140 = vst [vmem:[#allocation6 + $0x28] sm:$0xff] %v132_v13  ;;  %v125_v1 = vpop.permute.xlu1 %124 }
 0x14e   :  { %v129_v15 = vadd.f32 %v125_v1, %v111_v14  ;;  %v130_v16 = vadd.f32 %v125_v1, %v112_v2  ;;  %v133_v17 = vadd.f32 %v125_v1, %v115_v4  ;;  %v134_v18 = vadd.f32 %v125_v1, %v116_v0 }
 0x150   :  { %137 = vst [vmem:[#allocation6 + $0x10] sm:$0xff] %v129_v15  ;;  %138 = vst [vmem:[#allocation6 + $0x18] sm:$0xff] %v130_v16 }
 0x151   :  { %141 = vst [vmem:[#allocation6 + $0x30] sm:$0xff] %v133_v17  ;;  %142 = vst [vmem:[#allocation6 + $0x38] sm:$0xff] %v134_v18 }
 0x152   :  { %204 = shalt.err (!%p201_p12)
}
 0x153   :  { %s205_s12 = scalar_lea.hbm %s343_s4, 1024 }
 0x154   :  { %p206_p13 = scmp.ne.s32.totalorder %s343_s4, %s205_s12  ;;  %p209_p0 = scmp.lt.u32.totalorder %s205_s12, %s343_s4 }
 0x156   :  { %p211_p1 = pnand %p209_p0, %p206_p13 }
 0x158   :  { %214 = shalt.err (!%p211_p1)
}
 0x159   :  { %154 = dma.vmem_to_hbm [thread:$0]  %s149_s3, 1024, %s343_s4, [#allocation5], %s220_s24, %s220_s24, %s221_s25  }
 0x15a   :  { %217 = dma.done.wait [#allocation5], 1024  }
 0x15b   :  { %218 = vsyncadd [#allocation5], 4294966272 }
 0x15c   :  { %158 = vsyncpa [#allocation4], 1 }
 0x15d   :  { %159 = vsyncpa [#allocation5], 1 }

</bundles_post_ra>
